<compile_context>
chip_gen: v5e
topology: v5e:2x2
jax: 0.10.0
libtpu: 0.0.40
codegen_flags: <defaults>
</compile_context>

<pallas_src>
import jax
import jax.numpy as jnp
from jax.experimental import pallas as pl
from jax.experimental.pallas import tpu as pltpu


def _linear_kernel(x_ref, w_ref, b_ref, o_ref, acc_ref):
    # x_ref:   (TB, TK) VMEM   streamed per (batch, k) tile
    # w_ref:   (1, TK)  VMEM   resident across the batch axis
    # b_ref:   (1,)     SMEM   scalar bias
    # o_ref:   (1, TB)  VMEM   lane-dense output row (resident across the k axis)
    # acc_ref: (1, TB)  VMEM   f32 accumulator scratch
    k = pl.program_id(1)

    @pl.when(k == 0)
    def _():
        acc_ref[...] = jnp.zeros_like(acc_ref)

    acc_ref[...] += jax.lax.dot_general(
        w_ref[...], x_ref[...],
        dimension_numbers=(((1,), (1,)), ((), ())),   # (1,TK) x (TB,TK) -> (1,TB)
        preferred_element_type=jnp.float32,
    )

    @pl.when(k == pl.num_programs(1) - 1)
    def _():
        o_ref[...] = (acc_ref[...] + b_ref[0]).astype(o_ref.dtype)


def _choose_tiles(batch, input_dim, itemsize):
    """Pick (batch_tile, k_tile).

    batch_tile: multiple of 128 (lane-dense output row, sublane-aligned x rows).
    x tile kept <= ~4 MiB so the double-buffered pipeline stays well inside a
    32 MiB scoped-VMEM budget on v5e/v6e/v7x.
    """
    budget = 4 * 1024 * 1024
    padded_batch = ((batch + 127) // 128) * 128
    row_bytes = max(1, input_dim * itemsize)

    if 128 * row_bytes <= budget:
        # Full-D path: grow the batch tile as far as the budget allows.
        tb = (budget // row_bytes) // 128 * 128
        tb = max(128, min(tb, 4096, padded_batch))
        return tb, input_dim

    # Very wide D: tile the contraction too (tk must divide D and be lane-aligned).
    if input_dim % 128 == 0:
        max_tk = max(128, (budget // (128 * itemsize)) // 128 * 128)
        for cand in range(max_tk, 127, -128):
            if input_dim % cand == 0:
                return 128, cand
    # TODO(synk): D too wide for one tile and not cleanly divisible by a 128-multiple ->
    # fall back to whole-D with the minimum batch tile (may exceed the VMEM budget).
    return 128, input_dim


def logistic_regression_forward(x, weight, bias, *, block_batch=None, block_k=None):
    """Equivalent to torch.nn.Linear(input_dim, 1)(x).

    x:      (batch, input_dim) float32
    weight: (1, input_dim)     float32   (PyTorch layout, used as-is)
    bias:   (1,)               float32
    returns (batch, 1)         float32
    """
    batch, input_dim = x.shape
    out_dtype = x.dtype
    itemsize = jnp.dtype(x.dtype).itemsize

    tb_auto, tk_auto = _choose_tiles(batch, input_dim, itemsize)
    tb = block_batch if block_batch is not None else tb_auto
    tk = block_k if block_k is not None else tk_auto

    num_b = pl.cdiv(batch, tb)
    num_k = pl.cdiv(input_dim, tk)
    padded_batch = num_b * tb
    if padded_batch != batch:
        x = jnp.pad(x, ((0, padded_batch - batch), (0, 0)))

    w_row = weight.reshape(1, input_dim).astype(x.dtype)   # keep PyTorch (1, D) layout
    b1 = bias.reshape(1).astype(jnp.float32)               # SMEM scalar

    out_row = pl.pallas_call(
        _linear_kernel,
        out_shape=jax.ShapeDtypeStruct((1, padded_batch), out_dtype),
        grid_spec=pltpu.PrefetchScalarGridSpec(
            num_scalar_prefetch=0,
            grid=(num_b, num_k),
            in_specs=[
                pl.BlockSpec((tb, tk), lambda i, k: (i, k)),        # x: streamed per tile
                pl.BlockSpec((1, tk), lambda i, k: (0, k)),         # weight: tiny, resident per k
                pl.BlockSpec(memory_space=pltpu.MemorySpace.SMEM),  # bias: SMEM scalar
            ],
            out_specs=pl.BlockSpec((1, tb), lambda i, k: (0, i)),   # lane-dense output row
            scratch_shapes=[pltpu.VMEM((1, tb), jnp.float32)],      # f32 accumulator
        ),
        compiler_params=pltpu.CompilerParams(
            dimension_semantics=("parallel", "arbitrary"),  # batch shardable, K is a reduction
            vmem_limit_bytes=32 * 1024 * 1024,              # lifts v5e's 16 MiB scoped default
        ),
    )(x, w_row, b1)

    return out_row.reshape(padded_batch)[:batch].reshape(batch, 1)


if __name__ == "__main__":
    key = jax.random.PRNGKey(0)
    kx, kw, kb = jax.random.split(key, 3)

    batch, input_dim = 8, 32

    x = jax.random.normal(kx, (batch, input_dim), dtype=jnp.float32)
    # Deterministic param init mimicking nn.Linear's uniform(-1/sqrt(D), 1/sqrt(D))
    bound = 1.0 / (input_dim ** 0.5)
    weight = jax.random.uniform(kw, (1, input_dim), minval=-bound, maxval=bound,
                                dtype=jnp.float32)
    bias = jax.random.uniform(kb, (1,), minval=-bound, maxval=bound,
                              dtype=jnp.float32)

    out = logistic_regression_forward(x, weight, bias)
    out = jax.block_until_ready(out)

    # Reference check in plain JAX
    ref = x @ weight.T + bias
    assert out.shape == (batch, 1)
    assert jnp.allclose(out, ref, atol=1e-5), "mismatch vs reference"

    print("KERNEL_OK")
</pallas_src>

<mosaic_0001>
module attributes {stable_mosaic.version = 11 : i64} {
  func.func @_linear_kernel(%arg0: i32, %arg1: i32, %arg2: memref<128x32xf32, #tpu.memory_space<vmem>>, %arg3: memref<1x32xf32, #tpu.memory_space<vmem>>, %arg4: memref<1xf32, #tpu.memory_space<smem>>, %arg5: memref<1x128xf32, #tpu.memory_space<vmem>>, %arg6: memref<1x128xf32, #tpu.memory_space<vmem>>) attributes {dimension_semantics = [#tpu.dimension_semantics<parallel>, #tpu.dimension_semantics<arbitrary>], iteration_bounds = array<i64: 1, 1>, scalar_prefetch = 0 : i64, scratch_operands = 1 : i64, tpu.core_type = #tpu.core_type<tc>, window_params = [{transform_indices = @transform_0, window_bounds = array<i64: 128, 32>}, {transform_indices = @transform_1, window_bounds = array<i64: 1, 32>}, {transform_indices = @transform_2, window_bounds = array<i64: 1>}, {transform_indices = @transform_3, window_bounds = array<i64: 1, 128>}]} {
    %c0_i32 = arith.constant 0 : i32
    %0 = arith.cmpi eq, %arg1, %c0_i32 : i32
    %1 = arith.extui %0 : i1 to i32
    %c0_i32_0 = arith.constant 0 : i32
    %2 = arith.cmpi ne, %1, %c0_i32_0 : i32
    scf.if %2 {
      %cst_10 = arith.constant 0.000000e+00 : f32
      %12 = vector.broadcast %cst_10 : f32 to vector<1x128xf32>
      %c0_11 = arith.constant 0 : index
      %c0_12 = arith.constant 0 : index
      %13 = vector.load %arg6[%c0_11, %c0_12] : memref<1x128xf32, #tpu.memory_space<vmem>>, vector<1x128xf32>
      tpu.vector_store %arg6[%c0_11, %c0_12], %12 {strides = array<i32>} : memref<1x128xf32, #tpu.memory_space<vmem>>, vector<1x128xf32>,
    } else {
    }
    %c0 = arith.constant 0 : index
    %c0_1 = arith.constant 0 : index
    %3 = vector.load %arg6[%c0, %c0_1] : memref<1x128xf32, #tpu.memory_space<vmem>>, vector<1x128xf32>
    %c0_2 = arith.constant 0 : index
    %c0_3 = arith.constant 0 : index
    %4 = vector.load %arg3[%c0_2, %c0_3] : memref<1x32xf32, #tpu.memory_space<vmem>>, vector<1x32xf32>
    %c0_4 = arith.constant 0 : index
    %c0_5 = arith.constant 0 : index
    %5 = vector.load %arg2[%c0_4, %c0_5] : memref<128x32xf32, #tpu.memory_space<vmem>>, vector<128x32xf32>
    %cst = arith.constant dense<0.000000e+00> : vector<1x128xf32>
    %6 = tpu.matmul %4, %5, %cst {dimension_numbers = #tpu.dot_dimension_numbers<[1], [1], [0], [0], [0, 0, 1, 0], [], []>} : vector<1x32xf32>, vector<128x32xf32>, vector<1x128xf32> -> vector<1x128xf32>
    %7 = arith.addf %3, %6 : vector<1x128xf32>
    %c0_6 = arith.constant 0 : index
    %c0_7 = arith.constant 0 : index
    %8 = vector.load %arg6[%c0_6, %c0_7] : memref<1x128xf32, #tpu.memory_space<vmem>>, vector<1x128xf32>
    tpu.vector_store %arg6[%c0_6, %c0_7], %7 {strides = array<i32>} : memref<1x128xf32, #tpu.memory_space<vmem>>, vector<1x128xf32>,
    %c0_i32_8 = arith.constant 0 : i32
    %9 = arith.cmpi eq, %arg1, %c0_i32_8 : i32
    %10 = arith.extui %9 : i1 to i32
    %c0_i32_9 = arith.constant 0 : i32
    %11 = arith.cmpi ne, %10, %c0_i32_9 : i32
    scf.if %11 {
      %c0_10 = arith.constant 0 : index
      %c0_11 = arith.constant 0 : index
      %12 = vector.load %arg6[%c0_10, %c0_11] : memref<1x128xf32, #tpu.memory_space<vmem>>, vector<1x128xf32>
      %c0_12 = arith.constant 0 : index
      %13 = memref.load %arg4[%c0_12] : memref<1xf32, #tpu.memory_space<smem>>
      %14 = vector.broadcast %13 : f32 to vector<1x128xf32>
      %15 = arith.addf %12, %14 : vector<1x128xf32>
      %c0_13 = arith.constant 0 : index
      %c0_14 = arith.constant 0 : index
      %16 = vector.load %arg5[%c0_13, %c0_14] : memref<1x128xf32, #tpu.memory_space<vmem>>, vector<1x128xf32>
      tpu.vector_store %arg5[%c0_13, %c0_14], %15 {strides = array<i32>} : memref<1x128xf32, #tpu.memory_space<vmem>>, vector<1x128xf32>,
    } else {
    }
    return
  }
  func.func @transform_0(%arg0: i32, %arg1: i32) -> (i32, i32) {
    %c0_i32 = arith.constant 0 : i32
    return %arg0, %arg1 : i32, i32
  }
  func.func @transform_1(%arg0: i32, %arg1: i32) -> (i32, i32) {
    %c0_i32 = arith.constant 0 : i32
    %c0_i32_0 = arith.constant 0 : i32
    return %c0_i32, %arg1 : i32, i32
  }
  func.func @transform_2(%arg0: i32, %arg1: i32) -> i32 {
    %c0_i32 = arith.constant 0 : i32
    %c0_i32_0 = arith.constant 0 : i32
    return %c0_i32 : i32
  }
  func.func @transform_3(%arg0: i32, %arg1: i32) -> (i32, i32) {
    %c0_i32 = arith.constant 0 : i32
    %c0_i32_0 = arith.constant 0 : i32
    return %c0_i32, %arg0 : i32, i32
  }
}

</mosaic_0001>

<bundles_post_ra>
// kernel: tpu_custom_call.1
= control target key start
LH: loop header
LB: loop body
LE: loop exit
PB: predicated region body
PF: predicated region fallthrough
CT: control target
= control target key end

     0   :  { %vm39_vm0 = vcmask 261120   ;;  %s278_s0 = inlined_call_operand.vmem [shape: f32[128,32], index: 0, kind: input, shape index: {}]   ;;  %s279_s1 = inlined_call_operand.vmem [shape: f32[1,32], index: 1, kind: input, shape index: {}]   ;;  %s280_s2 = inlined_call_operand.<no memory space> [shape: f32[1], index: 2, kind: input, shape index: {}]   ;;  %s281_s3 = inlined_call_operand.hbm [shape: f32[1,128], index: 3, kind: output, shape index: {}]  }
   0x1   :  { %v38_v0 = vld [vmem:[%s278_s0 + $0x78] sm:$0xff]  ;;  %v37_v1 = vld [vmem:[%s278_s0 + $0x70] sm:$0xff] }
   0x2   :  { %137 = vmatpush.xpose.msk.msra.mxu0 %vm39_vm0, %v38_v0 }
   0x3   :  { %9 = vsyncpa [#allocation5], 0  ;;  %v36_v2 = vld [vmem:[%s278_s0 + $0x68] sm:$0xff]  ;;  %v35_v3 = vld [vmem:[%s278_s0 + $0x60] sm:$0xff]  ;;  %v182_v9 = vmov 0.0   ;;  %v118_v21 = vstv %s280_s2  ;;  %s183_s21 = smov [#allocation4]  }
   0x4   :  { %v34_v4 = vld [vmem:[%s278_s0 + $0x58] sm:$0xff]  ;;  %v33_v5 = vld [vmem:[%s278_s0 + $0x50] sm:$0xff]  ;;  %v32_v6 = vld [vmem:[%s278_s0 + $0x48] sm:$0xff]  ;;  %20 = vst [vmem:[#allocation2] sm:$0x1] %v182_v9  ;;  %s126_s22 = sshll.u32 %s183_s21, 4  ;;  %s127_s22 = int_to_ptr.vmem [resolvable:$true] %s126_s22 }
   0x5   :  { %v31_v7 = vld [vmem:[%s278_s0 + $0x40] sm:$0xff]  ;;  %v30_v8 = vld [vmem:[%s278_s0 + $0x38] sm:$0xff]  ;;  %v29_v10 = vld [vmem:[%s278_s0 + $0x30] sm:$0xff]  ;;  %s128_s24 = sshll.u32 %s281_s3, 4  ;;  %s129_s24 = int_to_ptr.hbm [resolvable:$true] %s128_s24 }
   0x6   :  { %138 = vmatpush.xpose.msk.msra.mxu0 %vm39_vm0, %v37_v1  ;;  %v28_v11 = vld [vmem:[%s278_s0 + $0x28] sm:$0xff]  ;;  %v27_v12 = vld [vmem:[%s278_s0 + $0x20] sm:$0xff]  ;;  %v26_v13 = vld [vmem:[%s278_s0 + $0x18] sm:$0xff] }
   0x7   :  { %v25_v14 = vld [vmem:[%s278_s0 + $0x10] sm:$0xff]  ;;  %v24_v15 = vld [vmem:[%s278_s0 + $0x8] sm:$0xff]  ;;  %v23_v16 = vld [vmem:[%s278_s0] sm:$0xff] }
   0x8   :  { %v22_v17 = vld [vmem:[%s279_s1] sm:$0x1] }
   0xa   :  { %139 = vmatpush.xpose.msk.msra.mxu0 %vm39_vm0, %v36_v2 }
   0xb   :  { %v21_v18 = vld [vmem:[#allocation2] sm:$0x1] }
   0xe   :  { %140 = vmatpush.xpose.msk.msra.mxu0 %vm39_vm0, %v35_v3 }
  0x12   :  { %141 = vmatpush.xpose.msk.msra.mxu0 %vm39_vm0, %v34_v4 }
  0x16   :  { %142 = vmatpush.xpose.msk.msra.mxu0 %vm39_vm0, %v33_v5 }
  0x1a   :  { %143 = vmatpush.xpose.msk.msra.mxu0 %vm39_vm0, %v32_v6 }
  0x1e   :  { %144 = vmatpush.xpose.msk.msra.mxu0 %vm39_vm0, %v31_v7 }
  0x22   :  { %145 = vmatpush.xpose.msk.msra.mxu0 %vm39_vm0, %v30_v8 }
  0x26   :  { %146 = vmatpush.xpose.msk.msra.mxu0 %vm39_vm0, %v29_v10 }
  0x2a   :  { %147 = vmatpush.xpose.msk.msra.mxu0 %vm39_vm0, %v28_v11 }
  0x2e   :  { %148 = vmatpush.xpose.msk.msra.mxu0 %vm39_vm0, %v27_v12 }
  0x32   :  { %149 = vmatpush.xpose.msk.msra.mxu0 %vm39_vm0, %v26_v13 }
  0x36   :  { %150 = vmatpush.xpose.msk.msra.mxu0 %vm39_vm0, %v25_v14 }
  0x3a   :  { %151 = vmatpush.xpose.msk.msra.mxu0 %vm39_vm0, %v24_v15 }
  0x3e   :  { %152 = vmatpush.xpose.msk.msra.mxu0 %vm39_vm0, %v23_v16 }
  0x41   :  { %153 = vmatmul.msk.f32.vlgmr.msra.gmra.mxu0 %vm39_vm0, %v22_v17 }
  0xbe   :  { %v108_v19 = vpop.f32.mrf.mxu0 }
  0xbf   :  { %v111_v20 = vadd.f32 %v108_v19, %v21_v18 }
  0xc1   :  { %112 = vst [vmem:[#allocation2] sm:$0x1] %v111_v20 }
  0xc8   :  { %v116_v22 = vld [vmem:[#allocation2] sm:$0x1] }
  0xc9   :  { %v119_v23 = vadd.f32 %v118_v21, %v116_v22 }
  0xcb   :  { %120 = vst [vmem:[#allocation4] sm:$0x1] %v119_v23 }
  0xcc   :  { %131 = dma.vmem_to_hbm [thread:$0]  %s127_s22, 16, %s129_s24, [#allocation5]  }
  0xcd   :  { %180 = dma.done.wait [#allocation5], 16  }
  0xce   :  { %181 = vsyncadd [#allocation5], 4294967280 }
  0xcf   :  { %136 = vsyncpa [#allocation5], 1 }

</bundles_post_ra>
